<compile_context>
chip_gen: v7x
topology: tpu7x:2x2x1
jax: 0.10.0
libtpu: 0.0.40
codegen_flags: <defaults>
</compile_context>

<pallas_src>
import jax
import jax.numpy as jnp
from jax import lax
from jax.experimental import pallas as pl
from jax.experimental.pallas import tpu as pltpu

MARGIN = 1.0
EPS = 1e-8            # torch.nn.functional.cosine_similarity eps
_NEG_BIG = -1e30      # bias for zero-padded anchor rows -> relu(...) == 0


def _round_up(x, m):
    return (x + m - 1) // m * m


def batch_all_triplet_margin_loss(anchor, positive, negative, *,
                                  margin=MARGIN, tm=256, tn=256, tk_max=1024,
                                  matmul_dtype=None):
    B, D = anchor.shape
    assert positive.shape == (B, D) and negative.shape == (B, D)

    # ---- tile sizes --------------------------------------------------------
    # Row tile: keep >=2 row tiles when B allows it (v7x megacore), sublane-
    # aligned to 8.  Column / feature tiles stay multiples of 128 (lane / MXU).
    tm = min(tm, max(8, _round_up((B + 1) // 2, 8)))
    tn = min(tn, _round_up(B, 128))
    Bm = _round_up(B, tm)
    Bn = _round_up(B, tn)
    Dp = _round_up(D, 128)
    tk = min(tk_max, Dp)
    Dp = _round_up(Dp, tk)

    grid_i, grid_j, grid_k = Bm // tm, Bn // tn, Dp // tk
    mask_cols = Bn != B

    # ---- wrapper-side per-row precompute (one fused XLA pass) --------------
    # NOTE(eps): cos_ap clamps the norm *product* at eps (exact torch semantics);
    # cos_an uses per-factor clamping so it stays separable as inv_a * inv_n —
    # identical unless a row/column norm is below ~1e-8.
    a32 = anchor.astype(jnp.float32)
    p32 = positive.astype(jnp.float32)
    n32 = negative.astype(jnp.float32)
    norm_a = jnp.sqrt(jnp.sum(a32 * a32, axis=-1))                       # [B]
    norm_p = jnp.sqrt(jnp.sum(p32 * p32, axis=-1))
    norm_n = jnp.sqrt(jnp.sum(n32 * n32, axis=-1))
    cos_ap = jnp.sum(a32 * p32, axis=-1) / jnp.maximum(norm_a * norm_p, EPS)
    inv_a = 1.0 / jnp.maximum(norm_a, EPS)                               # [B]
    inv_n = 1.0 / jnp.maximum(norm_n, EPS)                               # [B]
    bias = margin - cos_ap                                               # [B]

    # ---- pad / lay out kernel inputs ---------------------------------------
    a_in = anchor if matmul_dtype is None else anchor.astype(matmul_dtype)
    n_in = negative if matmul_dtype is None else negative.astype(matmul_dtype)
    a_pad = jnp.pad(a_in, ((0, Bm - B), (0, Dp - D)))                    # [Bm, Dp]
    nt_pad = jnp.pad(n_in.T, ((0, Dp - D), (0, Bn - B)))                 # [Dp, Bn]
    inv_a_col = jnp.pad(inv_a, (0, Bm - B)).reshape(Bm, 1).astype(jnp.float32)
    bias_col = jnp.pad(bias, (0, Bm - B),
                       constant_values=_NEG_BIG).reshape(Bm, 1).astype(jnp.float32)
    inv_n_row = jnp.pad(inv_n, (0, Bn - B)).reshape(1, Bn).astype(jnp.float32)

    def kernel(a_ref, nt_ref, inv_a_ref, bias_ref, inv_n_ref, o_ref, acc_ref):
        j = pl.program_id(1)
        k = pl.program_id(2)
        nk = pl.num_programs(2)

        @pl.when((j == 0) & (k == 0))
        def _zero_out():
            o_ref[...] = jnp.zeros_like(o_ref)

        @pl.when(k == 0)
        def _zero_acc():
            acc_ref[...] = jnp.zeros_like(acc_ref)

        # MXU matmul in native input dtype, f32 accumulation over the k axis.
        acc_ref[...] += jnp.dot(a_ref[...], nt_ref[...],
                                preferred_element_type=jnp.float32)

        @pl.when(k == nk - 1)
        def _epilogue():
            cos_an = acc_ref[...] * inv_a_ref[...] * inv_n_ref[...]      # [tm, tn]
            loss = jnp.maximum(cos_an + bias_ref[...], 0.0)              # relu(cos_an - cos_ap + m)
            if mask_cols:
                last_j = pl.num_programs(1) - 1

                @pl.when(j != last_j)
                def _interior():
                    o_ref[...] += jnp.sum(loss, axis=-1, keepdims=True)

                @pl.when(j == last_j)
                def _edge():
                    cols = lax.broadcasted_iota(jnp.int32, (1, tn), 1) + j * tn
                    masked = jnp.where(cols < B, loss, 0.0)
                    o_ref[...] += jnp.sum(masked, axis=-1, keepdims=True)
            else:
                o_ref[...] += jnp.sum(loss, axis=-1, keepdims=True)

    # ---- VMEM budget (double-buffered inputs + resident output + scratch) --
    itemsize = jnp.dtype(a_pad.dtype).itemsize
    est = (2 * (tm * tk + tk * tn) * itemsize     # A / N^T tiles (2 buffers each)
           + 2 * (2 * tm + tn) * 4                # inv_a, bias, inv_n
           + 2 * tm * 128 * 4                     # resident output block
           + tm * tn * 4)                         # f32 matmul accumulator
    vmem_limit = int(min(max(2 * est, 32 << 20), 64 << 20))

    partial = pl.pallas_call(
        kernel,
        out_shape=jax.ShapeDtypeStruct((Bm, 128), jnp.float32),
        grid=(grid_i, grid_j, grid_k),
        in_specs=[
            pl.BlockSpec((tm, tk), lambda i, j, k: (i, k)),   # anchor rows
            pl.BlockSpec((tk, tn), lambda i, j, k: (k, j)),   # negative^T cols
            pl.BlockSpec((tm, 1), lambda i, j, k: (i, 0)),    # 1 / ||anchor||
            pl.BlockSpec((tm, 1), lambda i, j, k: (i, 0)),    # margin - cos(anchor, positive)
            pl.BlockSpec((1, tn), lambda i, j, k: (0, j)),    # 1 / ||negative||
        ],
        out_specs=pl.BlockSpec((tm, 128), lambda i, j, k: (i, 0)),
        scratch_shapes=[pltpu.VMEM((tm, tn), jnp.float32)],
        compiler_params=pltpu.CompilerParams(
            dimension_semantics=("parallel", "arbitrary", "arbitrary"),
            vmem_limit_bytes=vmem_limit),
    )(a_pad, nt_pad, inv_a_col, bias_col, inv_n_row)

    # Every lane of a row carries the same accumulated row-sum; take lane 0.
    return jnp.sum(partial[:, 0]) / jnp.float32(B * B)


def _reference(anchor, positive, negative, margin=MARGIN):
    # Pure-JAX mirror of the PyTorch module (cosine_distance / pairwise_cosine_distance).
    def norm(x):
        return jnp.linalg.norm(x, axis=-1)

    cos_ap = jnp.sum(anchor * positive, axis=-1) / jnp.maximum(
        norm(anchor) * norm(positive), EPS)
    d_ap = 1.0 - cos_ap                                          # [B]
    num = anchor @ negative.T
    den = jnp.maximum(norm(anchor)[:, None] * norm(negative)[None, :], EPS)
    d_an = 1.0 - num / den                                       # [B, B]
    return jnp.mean(jnp.maximum(d_ap[:, None] - d_an + margin, 0.0))


if __name__ == "__main__":
    key = jax.random.PRNGKey(0)
    k1, k2, k3, k4, k5, k6 = jax.random.split(key, 6)

    # Small embedding batch consistent with the module's forward.
    B, D = 8, 32
    anchor = jax.random.normal(k1, (B, D), dtype=jnp.float32)
    positive = jax.random.normal(k2, (B, D), dtype=jnp.float32)
    negative = jax.random.normal(k3, (B, D), dtype=jnp.float32)
    loss = batch_all_triplet_margin_loss(anchor, positive, negative)
    jax.block_until_ready(loss)
    ref = _reference(anchor, positive, negative)
    assert jnp.allclose(loss, ref, rtol=1e-4, atol=1e-4), (loss, ref)

    # Shape exercising multiple row tiles (megacore split) + column masking path.
    B2, D2 = 160, 96
    a2 = jax.random.normal(k4, (B2, D2), dtype=jnp.float32)
    p2 = jax.random.normal(k5, (B2, D2), dtype=jnp.float32)
    n2 = jax.random.normal(k6, (B2, D2), dtype=jnp.float32)
    loss2 = batch_all_triplet_margin_loss(a2, p2, n2)
    jax.block_until_ready(loss2)
    ref2 = _reference(a2, p2, n2)
    assert jnp.allclose(loss2, ref2, rtol=1e-4, atol=1e-4), (loss2, ref2)

    print("KERNEL_OK")
</pallas_src>

<mosaic_0001>
module attributes {stable_mosaic.version = 11 : i64} {
  func.func @kernel(%arg0: i32, %arg1: i32, %arg2: i32, %arg3: memref<8x128xf32, #tpu.memory_space<vmem>>, %arg4: memref<128x128xf32, #tpu.memory_space<vmem>>, %arg5: memref<8x1xf32, #tpu.memory_space<vmem>>, %arg6: memref<8x1xf32, #tpu.memory_space<vmem>>, %arg7: memref<1x128xf32, #tpu.memory_space<vmem>>, %arg8: memref<8x128xf32, #tpu.memory_space<vmem>>, %arg9: memref<8x128xf32, #tpu.memory_space<vmem>>) attributes {dimension_semantics = [#tpu.dimension_semantics<parallel>, #tpu.dimension_semantics<arbitrary>, #tpu.dimension_semantics<arbitrary>], iteration_bounds = array<i64: 1, 1, 1>, scalar_prefetch = 0 : i64, scratch_operands = 1 : i64, tpu.core_type = #tpu.core_type<tc>, window_params = [{transform_indices = @transform_0, window_bounds = array<i64: 8, 128>}, {transform_indices = @transform_1, window_bounds = array<i64: 128, 128>}, {transform_indices = @transform_2, window_bounds = array<i64: 8, 1>}, {transform_indices = @transform_3, window_bounds = array<i64: 8, 1>}, {transform_indices = @transform_4, window_bounds = array<i64: 1, 128>}, {transform_indices = @transform_5, window_bounds = array<i64: 8, 128>}]} {
    %c0_i32 = arith.constant 0 : i32
    %0 = arith.cmpi eq, %arg1, %c0_i32 : i32
    %c0_i32_0 = arith.constant 0 : i32
    %1 = arith.cmpi eq, %arg2, %c0_i32_0 : i32
    %2 = arith.andi %0, %1 : i1
    %3 = arith.extui %2 : i1 to i32
    %c0_i32_1 = arith.constant 0 : i32
    %4 = arith.cmpi ne, %3, %c0_i32_1 : i32
    scf.if %4 {
      %cst_13 = arith.constant 0.000000e+00 : f32
      %17 = vector.broadcast %cst_13 : f32 to vector<8x128xf32>
      %c0_14 = arith.constant 0 : index
      %c0_15 = arith.constant 0 : index
      %18 = vector.load %arg8[%c0_14, %c0_15] : memref<8x128xf32, #tpu.memory_space<vmem>>, vector<8x128xf32>
      tpu.vector_store %arg8[%c0_14, %c0_15], %17 {strides = array<i32>} : memref<8x128xf32, #tpu.memory_space<vmem>>, vector<8x128xf32>,
    } else {
    }
    %c0_i32_2 = arith.constant 0 : i32
    %5 = arith.cmpi eq, %arg2, %c0_i32_2 : i32
    %6 = arith.extui %5 : i1 to i32
    %c0_i32_3 = arith.constant 0 : i32
    %7 = arith.cmpi ne, %6, %c0_i32_3 : i32
    scf.if %7 {
      %cst_13 = arith.constant 0.000000e+00 : f32
      %17 = vector.broadcast %cst_13 : f32 to vector<8x128xf32>
      %c0_14 = arith.constant 0 : index
      %c0_15 = arith.constant 0 : index
      %18 = vector.load %arg9[%c0_14, %c0_15] : memref<8x128xf32, #tpu.memory_space<vmem>>, vector<8x128xf32>
      tpu.vector_store %arg9[%c0_14, %c0_15], %17 {strides = array<i32>} : memref<8x128xf32, #tpu.memory_space<vmem>>, vector<8x128xf32>,
    } else {
    }
    %c0 = arith.constant 0 : index
    %c0_4 = arith.constant 0 : index
    %8 = vector.load %arg9[%c0, %c0_4] : memref<8x128xf32, #tpu.memory_space<vmem>>, vector<8x128xf32>
    %c0_5 = arith.constant 0 : index
    %c0_6 = arith.constant 0 : index
    %9 = vector.load %arg3[%c0_5, %c0_6] : memref<8x128xf32, #tpu.memory_space<vmem>>, vector<8x128xf32>
    %c0_7 = arith.constant 0 : index
    %c0_8 = arith.constant 0 : index
    %10 = vector.load %arg4[%c0_7, %c0_8] : memref<128x128xf32, #tpu.memory_space<vmem>>, vector<128x128xf32>
    %cst = arith.constant dense<0.000000e+00> : vector<8x128xf32>
    %11 = tpu.matmul %9, %10, %cst {dimension_numbers = #tpu.dot_dimension_numbers<[1], [0], [0], [1], [0, 0, 1, 1], [], []>} : vector<8x128xf32>, vector<128x128xf32>, vector<8x128xf32> -> vector<8x128xf32>
    %12 = arith.addf %8, %11 : vector<8x128xf32>
    %c0_9 = arith.constant 0 : index
    %c0_10 = arith.constant 0 : index
    %13 = vector.load %arg9[%c0_9, %c0_10] : memref<8x128xf32, #tpu.memory_space<vmem>>, vector<8x128xf32>
    tpu.vector_store %arg9[%c0_9, %c0_10], %12 {strides = array<i32>} : memref<8x128xf32, #tpu.memory_space<vmem>>, vector<8x128xf32>,
    %c0_i32_11 = arith.constant 0 : i32
    %14 = arith.cmpi eq, %arg2, %c0_i32_11 : i32
    %15 = arith.extui %14 : i1 to i32
    %c0_i32_12 = arith.constant 0 : i32
    %16 = arith.cmpi ne, %15, %c0_i32_12 : i32
    scf.if %16 {
      %c0_13 = arith.constant 0 : index
      %c0_14 = arith.constant 0 : index
      %17 = vector.load %arg9[%c0_13, %c0_14] : memref<8x128xf32, #tpu.memory_space<vmem>>, vector<8x128xf32>
      %c0_15 = arith.constant 0 : index
      %c0_16 = arith.constant 0 : index
      %18 = vector.load %arg5[%c0_15, %c0_16] : memref<8x1xf32, #tpu.memory_space<vmem>>, vector<8x1xf32>
      %19 = vector.broadcast %18 : vector<8x1xf32> to vector<8x128xf32>
      %20 = arith.mulf %17, %19 : vector<8x128xf32>
      %c0_17 = arith.constant 0 : index
      %c0_18 = arith.constant 0 : index
      %21 = vector.load %arg7[%c0_17, %c0_18] : memref<1x128xf32, #tpu.memory_space<vmem>>, vector<1x128xf32>
      %22 = vector.broadcast %21 : vector<1x128xf32> to vector<8x128xf32>
      %23 = arith.mulf %20, %22 : vector<8x128xf32>
      %c0_19 = arith.constant 0 : index
      %c0_20 = arith.constant 0 : index
      %24 = vector.load %arg6[%c0_19, %c0_20] : memref<8x1xf32, #tpu.memory_space<vmem>>, vector<8x1xf32>
      %25 = vector.broadcast %24 : vector<8x1xf32> to vector<8x128xf32>
      %26 = arith.addf %23, %25 : vector<8x128xf32>
      %cst_21 = arith.constant 0.000000e+00 : f32
      %27 = vector.broadcast %cst_21 : f32 to vector<8x128xf32>
      %28 = arith.maximumf %26, %27 : vector<8x128xf32>
      %c0_i32_22 = arith.constant 0 : i32
      %29 = arith.cmpi ne, %arg1, %c0_i32_22 : i32
      %30 = arith.extui %29 : i1 to i32
      %c0_i32_23 = arith.constant 0 : i32
      %31 = arith.cmpi ne, %30, %c0_i32_23 : i32
      scf.if %31 {
        %c0_26 = arith.constant 0 : index
        %c0_27 = arith.constant 0 : index
        %35 = vector.load %arg8[%c0_26, %c0_27] : memref<8x128xf32, #tpu.memory_space<vmem>>, vector<8x128xf32>
        %cst_28 = arith.constant dense<0.000000e+00> : vector<8xf32>
        %36 = vector.multi_reduction <add>, %28, %cst_28 [1] : vector<8x128xf32> to vector<8xf32>
        %37 = vector.shape_cast %36 : vector<8xf32> to vector<8x1xf32>
        %38 = vector.broadcast %37 : vector<8x1xf32> to vector<8x128xf32>
        %39 = arith.addf %35, %38 : vector<8x128xf32>
        %c0_29 = arith.constant 0 : index
        %c0_30 = arith.constant 0 : index
        %40 = vector.load %arg8[%c0_29, %c0_30] : memref<8x128xf32, #tpu.memory_space<vmem>>, vector<8x128xf32>
        tpu.vector_store %arg8[%c0_29, %c0_30], %39 {strides = array<i32>} : memref<8x128xf32, #tpu.memory_space<vmem>>, vector<8x128xf32>,
      } else {
      }
      %c0_i32_24 = arith.constant 0 : i32
      %32 = arith.cmpi eq, %arg1, %c0_i32_24 : i32
      %33 = arith.extui %32 : i1 to i32
      %c0_i32_25 = arith.constant 0 : i32
      %34 = arith.cmpi ne, %33, %c0_i32_25 : i32
      scf.if %34 {
        %35 = tpu.iota {dimensions = array<i32: 1>} : vector<1x128xi32>
        %c128_i32 = arith.constant 128 : i32
        %36 = arith.muli %arg1, %c128_i32 : i32
        %37 = vector.broadcast %36 : i32 to vector<1x128xi32>
        %38 = arith.addi %35, %37 : vector<1x128xi32>
        %c8_i32 = arith.constant 8 : i32
        %39 = vector.broadcast %c8_i32 : i32 to vector<1x128xi32>
        %40 = arith.cmpi slt, %38, %39 : vector<1x128xi32>
        %cst_26 = arith.constant 0.000000e+00 : f32
        %41 = vector.shape_cast %40 : vector<1x128xi1> to vector<1x128xi1>
        %42 = vector.broadcast %41 : vector<1x128xi1> to vector<8x128xi1>
        %43 = vector.broadcast %cst_26 : f32 to vector<8x128xf32>
        %44 = arith.select %42, %28, %43 : vector<8x128xi1>, vector<8x128xf32>
        %c0_27 = arith.constant 0 : index
        %c0_28 = arith.constant 0 : index
        %45 = vector.load %arg8[%c0_27, %c0_28] : memref<8x128xf32, #tpu.memory_space<vmem>>, vector<8x128xf32>
        %cst_29 = arith.constant dense<0.000000e+00> : vector<8xf32>
        %46 = vector.multi_reduction <add>, %44, %cst_29 [1] : vector<8x128xf32> to vector<8xf32>
        %47 = vector.shape_cast %46 : vector<8xf32> to vector<8x1xf32>
        %48 = vector.broadcast %47 : vector<8x1xf32> to vector<8x128xf32>
        %49 = arith.addf %45, %48 : vector<8x128xf32>
        %c0_30 = arith.constant 0 : index
        %c0_31 = arith.constant 0 : index
        %50 = vector.load %arg8[%c0_30, %c0_31] : memref<8x128xf32, #tpu.memory_space<vmem>>, vector<8x128xf32>
        tpu.vector_store %arg8[%c0_30, %c0_31], %49 {strides = array<i32>} : memref<8x128xf32, #tpu.memory_space<vmem>>, vector<8x128xf32>,
      } else {
      }
    } else {
    }
    return
  }
  func.func @transform_0(%arg0: i32, %arg1: i32, %arg2: i32) -> (i32, i32) {
    %c0_i32 = arith.constant 0 : i32
    return %arg0, %arg2 : i32, i32
  }
  func.func @transform_1(%arg0: i32, %arg1: i32, %arg2: i32) -> (i32, i32) {
    %c0_i32 = arith.constant 0 : i32
    return %arg2, %arg1 : i32, i32
  }
  func.func @transform_2(%arg0: i32, %arg1: i32, %arg2: i32) -> (i32, i32) {
    %c0_i32 = arith.constant 0 : i32
    %c0_i32_0 = arith.constant 0 : i32
    return %arg0, %c0_i32 : i32, i32
  }
  func.func @transform_3(%arg0: i32, %arg1: i32, %arg2: i32) -> (i32, i32) {
    %c0_i32 = arith.constant 0 : i32
    %c0_i32_0 = arith.constant 0 : i32
    return %arg0, %c0_i32 : i32, i32
  }
  func.func @transform_4(%arg0: i32, %arg1: i32, %arg2: i32) -> (i32, i32) {
    %c0_i32 = arith.constant 0 : i32
    %c0_i32_0 = arith.constant 0 : i32
    return %c0_i32, %arg1 : i32, i32
  }
  func.func @transform_5(%arg0: i32, %arg1: i32, %arg2: i32) -> (i32, i32) {
    %c0_i32 = arith.constant 0 : i32
    %c0_i32_0 = arith.constant 0 : i32
    return %arg0, %c0_i32 : i32, i32
  }
}

</mosaic_0001>

<bundles_post_ra>
// kernel: tpu_custom_call.1
= control target key start
LH: loop header
LB: loop body
LE: loop exit
PB: predicated region body
PF: predicated region fallthrough
CT: control target
= control target key end

     0   :  { %10 = vsyncpa [#allocation4], 0  ;;  %s412_s0 = inlined_call_operand.vmem [shape: f32[8,128], index: 0, kind: input, shape index: {}]   ;;  %s413_s1 = inlined_call_operand.hbm [shape: f32[128,128], index: 1, kind: input, shape index: {}]   ;;  %s414_s2 = inlined_call_operand.vmem [shape: f32[8,1], index: 2, kind: input, shape index: {}]   ;;  %s415_s3 = inlined_call_operand.vmem [shape: f32[8,1], index: 3, kind: input, shape index: {}]   ;;  %s416_s4 = inlined_call_operand.vmem [shape: f32[1,128], index: 4, kind: input, shape index: {}]   ;;  %s417_s5 = inlined_call_operand.hbm [shape: f32[8,128], index: 5, kind: output, shape index: {}]  }
   0x1   :  { %11 = vsyncpa [#allocation5], 0  ;;  %s338_s18 = smov [#allocation3]   ;;  %s290_s22 = scalar_lea.hbm %s413_s1, 2048 }
   0x2   :  { %s19_s19 = sshll.u32 %s338_s18, 4  ;;  %p291_p0 = scmp.ne.s32.totalorder %s413_s1, %s290_s22  ;;  %s20_s19 = int_to_ptr.vmem [resolvable:$true] %s19_s19 }
   0x3   :  { %p294_p1 = scmp.lt.u32.totalorder %s290_s22, %s413_s1 }
   0x5   :  { %p296_p2 = pnand %p294_p1, %p291_p0 }
   0x7   :  { %299 = shalt.err (!%p296_p2)
}
   0x8   :  { %s300_s27 = scalar_lea.vmem %s20_s19, 2048  ;;  %p305_p4 = scmp.lt.s32.totalorder %s20_s19, %s20_s19 }
   0x9   :  { %p301_p3 = scmp.ne.s32.totalorder %s20_s19, %s300_s27  ;;  %p306_p5 = scmp.lt.s32.totalorder %s300_s27, %s300_s27 }
   0xb   :  { %p307_p6 = por %p306_p5, %p305_p4 }
   0xd   :  { %p308_p7 = pnand %p307_p6, %p301_p3 }
   0xf   :  { %311 = shalt.err (!%p308_p7)
}
  0x10   :  { %s339_s28 = smov 128   ;;  %s340_s29 = smov 8  }
  0x11   :  { %25 = dma.hbm_to_vmem [thread:$0]  %s413_s1, 2048, %s20_s19, [#allocation4], %s339_s28, %s339_s28, %s340_s29  }
  0x12   :  { %334 = dma.done.wait [#allocation4], 2048  }
  0x13   :  { %335 = vsyncadd [#allocation4], 4294965248  ;;  %v341_v0 = vmov 0.0|0.0   ;;  %vm342_vm0 = vmmov 0   ;;  %v343_v1 = vmov 0.0   ;;  %v344_v2 = vmov 0  }
  0x14   :  { %257 = vmatprep.subr.bf16.mxu0 %v341_v0  ;;  %254 = vmatprep.mubr.msk.f32.mxu0 %vm342_vm0, %v343_v1  ;;  %v48_v3 = vld [vmem:[#allocation3] sm:$0xff]  ;;  %v49_v4 = vld [vmem:[#allocation3 + $0x8] sm:$0xff]  ;;  %v50_v5 = vld [vmem:[#allocation3 + $0x10] sm:$0xff]  ;;  %v175_v31 = vlaneseq  ;;  %s345_s12 = smov [#allocation6]  }
  0x15   :  { %289 = vset.pattern.permute.xlu0 %v344_v2  ;;  %v258_v6 = vpack.c.bf16 %v49_v4, %v48_v3  ;;  %v51_v7 = vld [vmem:[#allocation3 + $0x18] sm:$0xff]  ;;  %v52_v9 = vld [vmem:[#allocation3 + $0x20] sm:$0xff]  ;;  %v53_v10 = vld [vmem:[#allocation3 + $0x28] sm:$0xff] }
  0x16   :  { %v261_v8 = vpack.c.bf16 %v51_v7, %v50_v5  ;;  %v140_v11 = vld [vmem:[%s414_s2] sm:$0xff]  ;;  %v264_v12 = vpack.c.bf16 %v53_v10, %v52_v9  ;;  %v54_v14 = vld [vmem:[#allocation3 + $0x30] sm:$0xff]  ;;  %v55_v15 = vld [vmem:[#allocation3 + $0x38] sm:$0xff]  ;;  %v176_v36 = vand.u32 127, %v175_v31 }
  0x17   :  { %259 = vmatpush3.bf16.msra.mxu0 %v258_v6  ;;  %143 = vperm.xlu0 %289, %v140_v11   ;;  %v155_v13 = vld [vmem:[%s415_s3] sm:$0xff]  ;;  %v267_v16 = vpack.c.bf16 %v55_v15, %v54_v14  ;;  %v57_v18 = vld [vmem:[#allocation3 + $0x48] sm:$0xff]  ;;  %v58_v20 = vld [vmem:[#allocation3 + $0x50] sm:$0xff] }
  0x18   :  { %260 = vmatprep.subr.bf16.mxu0 %v341_v0  ;;  %v56_v17 = vld [vmem:[#allocation3 + $0x40] sm:$0xff]  ;;  %v59_v21 = vld [vmem:[#allocation3 + $0x58] sm:$0xff]  ;;  %v61_v24 = vld [vmem:[#allocation3 + $0x68] sm:$0xff]  ;;  %vm180_vm1 = vcmp.lt.s32.totalorder %v176_v36, 8 }
  0x19   :  { %v270_v19 = vpack.c.bf16 %v57_v18, %v56_v17  ;;  %v273_v22 = vpack.c.bf16 %v59_v21, %v58_v20  ;;  %v60_v23 = vld [vmem:[#allocation3 + $0x60] sm:$0xff]  ;;  %v62_v26 = vld [vmem:[#allocation3 + $0x70] sm:$0xff]  ;;  %v63_v27 = vld [vmem:[#allocation3 + $0x78] sm:$0xff] }
  0x1a   :  { %v276_v25 = vpack.c.bf16 %v61_v24, %v60_v23  ;;  %v279_v28 = vpack.c.bf16 %v63_v27, %v62_v26  ;;  %v47_v29 = vld [vmem:[%s412_s0] sm:$0xff]  ;;  %s195_s0 = sshll.u32 %s345_s12, 4  ;;  %s196_s0 = int_to_ptr.vmem [resolvable:$true] %s195_s0 }
  0x1b   :  { %262 = vmatpush3.bf16.msra.mxu0 %v261_v8  ;;  %158 = vperm.xlu0 %289, %v155_v13   ;;  %v204_v33 = vld [vmem:[%s416_s4] ss:$0 sm:$0xff]  ;;  %s312_s13 = scalar_lea.vmem %s196_s0, 128  ;;  %p317_p9 = scmp.lt.s32.totalorder %s196_s0, %s196_s0 }
  0x1c   :  { %263 = vmatprep.subr.bf16.mxu0 %v341_v0  ;;  %p313_p8 = scmp.ne.s32.totalorder %s196_s0, %s312_s13  ;;  %p318_p10 = scmp.lt.s32.totalorder %s312_s13, %s312_s13 }
  0x1e   :  { %p319_p11 = por %p318_p10, %p317_p9 }
  0x1f   :  { %265 = vmatpush3.bf16.msra.mxu0 %v264_v12 }
  0x20   :  { %266 = vmatprep.subr.bf16.mxu0 %v341_v0  ;;  %p320_p12 = pnand %p319_p11, %p313_p8 }
  0x23   :  { %268 = vmatpush3.bf16.msra.mxu0 %v267_v16 }
  0x24   :  { %269 = vmatprep.subr.bf16.mxu0 %v341_v0 }
  0x27   :  { %271 = vmatpush3.bf16.msra.mxu0 %v270_v19 }
  0x28   :  { %272 = vmatprep.subr.bf16.mxu0 %v341_v0 }
  0x2b   :  { %274 = vmatpush3.bf16.msra.mxu0 %v273_v22 }
  0x2c   :  { %275 = vmatprep.subr.bf16.mxu0 %v341_v0 }
  0x2f   :  { %277 = vmatpush3.bf16.msra.mxu0 %v276_v25 }
  0x30   :  { %278 = vmatprep.subr.bf16.mxu0 %v341_v0 }
  0x33   :  { %280 = vmatpush3.bf16.msra.mxu0 %v279_v28 }
  0x36   :  { %255 = vmatmul.mubr.f32.vlgmr.msra.gmra.mrb[0].mxu0 %v47_v29 }
  0x96   :  { %v144_v30 = vpop.permute.xlu0 %143 }
  0x9a   :  { %v159_v38 = vpop.permute.xlu0 %158 }
 0x109   :  { %v130_v32 = vpop.f32.mrb[0].mxu0 }
 0x10a   :  { %v146_v34 = vmul.f32 %v144_v30, %v130_v32  ;;  %v256_v35 = vpop.f32.mrb[1].mxu0 }
 0x10c   :  { %v154_v37 = vmul.f32 %v204_v33, %v146_v34 }
 0x10e   :  { %v161_v39 = vadd.f32 %v159_v38, %v154_v37 }
 0x110   :  { %v162_v40 = vmax.f32 %v161_v39, 0.0 }
 0x112   :  { %v183_v41 = vsel %vm180_vm1, %v162_v40, 0.0 }
 0x113   :  { %185 = vadd.xlane.f32.xlu1 %v183_v41 }
 0x1a0   :  { %v186_v42 = vpop.xlane.xlu1 %185 }
 0x1a1   :  { %188 = vst [vmem:[#allocation6] sm:$0xff] %v186_v42 }
 0x1a2   :  { %323 = shalt.err (!%p320_p12)
}
 0x1a3   :  { %s324_s15 = scalar_lea.hbm %s417_s5, 128 }
 0x1a4   :  { %p325_p13 = scmp.ne.s32.totalorder %s417_s5, %s324_s15  ;;  %p328_p0 = scmp.lt.u32.totalorder %s324_s15, %s417_s5 }
 0x1a6   :  { %p330_p1 = pnand %p328_p0, %p325_p13 }
 0x1a8   :  { %333 = shalt.err (!%p330_p1)
}
 0x1a9   :  { %198 = dma.vmem_to_hbm [thread:$0]  %s196_s0, 128, %s417_s5, [#allocation5]  }
 0x1aa   :  { %336 = dma.done.wait [#allocation5], 128  }
 0x1ab   :  { %337 = vsyncadd [#allocation5], 4294967168 }
 0x1ac   :  { %202 = vsyncpa [#allocation4], 1 }
 0x1ad   :  { %203 = vsyncpa [#allocation5], 1 }

</bundles_post_ra>
